<compile_context>
chip_gen: v5e
topology: v5e:2x2
jax: 0.10.0
libtpu: 0.0.40
codegen_flags: <defaults>
</compile_context>

<pallas_src>
import jax
import jax.numpy as jnp
from jax.experimental import pallas as pl
from jax.experimental.pallas import tpu as pltpu


def _round_up(x, m):
    return ((x + m - 1) // m) * m


# ----------------------------- fused kernel ---------------------------------
def _fused_kernel(labels_ref, x_ref, w1t_ref, b1c_ref, w2at_ref,
                  proj_ref, emb_ref, cnt_ref, acc_ref):
    nt = pl.program_id(1)
    TN = x_ref.shape[2]
    D2 = proj_ref.shape[1]
    DP = acc_ref.shape[0]          # padded feat dim; row DP-1 = ones/bias/count
    P = acc_ref.shape[1]

    # ---- elementwise features, channels-first: h = relu(W1padᵀ x + b1pad) [DP, TN]
    # Row DP-1 of (W1pad, b1pad) is (0, 1.0), so h[DP-1, :] == 1:
    #   * through the bias-augmented W2 column below it applies b2,
    #   * through the mask matmul it yields per-patch element counts.
    x = x_ref[0].astype(jnp.bfloat16)                                    # [C, TN]
    h = jnp.dot(w1t_ref[...], x, preferred_element_type=jnp.float32)     # [DP, TN]
    h = jnp.maximum(h + b1c_ref[...], 0.0)
    hb = h.astype(jnp.bfloat16)

    # ---- projected elementwise features (b2 folded into W2aug), lane-dense out
    pcf = jnp.dot(w2at_ref[...], hb, preferred_element_type=jnp.float32)  # [DP2, TN]
    proj_ref[0] = pcf[:D2, :].astype(proj_ref.dtype)                      # [D2, TN]

    # ---- group-by: per-patch partial sums (counts come via the ones row)
    labels = labels_ref[0]                                               # [TN, 1] int32
    piota = jax.lax.broadcasted_iota(jnp.int32, (TN, P), 1)
    mask_t = (labels == piota).astype(jnp.bfloat16)                      # [TN, P]
    part = jnp.dot(hb, mask_t, preferred_element_type=jnp.float32)       # [DP, P]

    @pl.when(nt == 0)
    def _():
        acc_ref[...] = jnp.zeros_like(acc_ref)

    acc_ref[...] += part

    # ---- finalize on the last N-tile: masked mean + patch-level MLP
    @pl.when(nt == pl.num_programs(1) - 1)
    def _():
        acc = acc_ref[...]                                               # [DP, P]
        counts = acc[DP - 1:DP, :]                                       # [1, P]
        denom = jnp.where(counts == 0.0, 1.0, counts)
        mean = acc / denom
        # Empty patches: torch computes mlp(0) = b2, so force the ones row to 1
        # (for non-empty patches counts/counts is already exactly 1).
        rowp = jax.lax.broadcasted_iota(jnp.int32, (DP, P), 0)
        mean = jnp.where(rowp == DP - 1, 1.0, mean)
        emb = jnp.dot(w2at_ref[...], mean.astype(jnp.bfloat16),
                      preferred_element_type=jnp.float32)                # [DP2, P]
        emb_ref[0] = emb.astype(emb_ref.dtype)
        cnt_ref[0] = counts.astype(cnt_ref.dtype)


class ElemPatchContrastModelPallas:
    def __init__(self, in_channels, feat_dim, proj_dim, num_patches,
                 sample_frac, max_samples, key, n_tile=1024):
        self.C = in_channels
        self.D = feat_dim
        self.D2 = proj_dim
        self.P = num_patches
        self.sample_frac = sample_frac
        self.max_samples = max_samples
        self.flatten_embeddings = False
        self.n_tile = n_tile
        # padded widths: +1 spare feature row reserved for the ones/bias/count row
        self.DP = _round_up(feat_dim + 1, 128)
        self.DP2 = _round_up(proj_dim, 128)

        k1, k2, k3, k4 = jax.random.split(key, 4)
        # deterministic synthetic parameters (backbone 1x1 conv + mlp), f32 originals
        self.w1 = 0.1 * jax.random.normal(k1, (self.C, self.D), jnp.float32)
        self.b1 = 0.01 * jax.random.normal(k2, (self.D,), jnp.float32)
        self.w2 = 0.1 * jax.random.normal(k3, (self.D, self.D2), jnp.float32)
        self.b2 = 0.01 * jax.random.normal(k4, (self.D2,), jnp.float32)

        # Kernel-side parameters: transposed for channels-first matmuls, zero-padded
        # to lane-aligned widths, bf16 for the MXU.  The spare row DP-1 of (W1, b1)
        # is (0, 1) so relu produces a constant ones row; b2 is folded into the
        # column of W2aug that this ones row multiplies.
        w1t = jnp.zeros((self.DP, self.C), jnp.float32).at[:self.D, :].set(self.w1.T)
        b1c = (jnp.zeros((self.DP, 1), jnp.float32)
               .at[:self.D, 0].set(self.b1)
               .at[self.DP - 1, 0].set(1.0))
        w2at = (jnp.zeros((self.DP2, self.DP), jnp.float32)
                .at[:self.D2, :self.D].set(self.w2.T)
                .at[:self.D2, self.DP - 1].set(self.b2))
        self.w1t = w1t.astype(jnp.bfloat16)
        self.b1c = b1c
        self.w2at = w2at.astype(jnp.bfloat16)

    # ------------------------- tiling helper --------------------------------
    def _pick_tile(self, n):
        # largest multiple-of-128 divisor of N that fits the (VMEM-driven) cap
        assert n % 128 == 0, "N = H*W must be a multiple of 128"  # TODO(synk): pad ragged N
        t = max(128, (min(self.n_tile, n) // 128) * 128)
        while n % t != 0:
            t -= 128
        return t

    # ------------------------- fused Pallas call -----------------------------
    def _fused(self, x3, labels3):
        B, C, N = x3.shape
        TN = self._pick_tile(N)
        NT = N // TN
        proj, emb, cnt = pl.pallas_call(
            _fused_kernel,
            out_shape=(
                jax.ShapeDtypeStruct((B, self.D2, N), jnp.float32),        # proj (channels-first)
                jax.ShapeDtypeStruct((B, self.DP2, self.P), jnp.float32),  # patch emb (padded rows)
                jax.ShapeDtypeStruct((B, 1, self.P), jnp.float32),         # counts
            ),
            grid=(B, NT),
            in_specs=[
                pl.BlockSpec((1, TN, 1), lambda b, n: (b, n, 0)),          # labels
                pl.BlockSpec((1, C, TN), lambda b, n: (b, 0, n)),          # x
                pl.BlockSpec((self.DP, C), lambda b, n: (0, 0)),           # W1padᵀ (bf16)
                pl.BlockSpec((self.DP, 1), lambda b, n: (0, 0)),           # b1pad (column)
                pl.BlockSpec((self.DP2, self.DP), lambda b, n: (0, 0)),    # W2augᵀ (bf16)
            ],
            out_specs=(
                pl.BlockSpec((1, self.D2, TN), lambda b, n: (b, 0, n)),
                pl.BlockSpec((1, self.DP2, self.P), lambda b, n: (b, 0, 0)),
                pl.BlockSpec((1, 1, self.P), lambda b, n: (b, 0, 0)),
            ),
            scratch_shapes=[pltpu.VMEM((self.DP, self.P), jnp.float32)],
            compiler_params=pltpu.CompilerParams(
                dimension_semantics=("parallel", "arbitrary"),
                vmem_limit_bytes=32 * 1024 * 1024),
        )(labels3, x3, self.w1t, self.b1c, self.w2at)
        return proj, emb, cnt

    # ------------------------- sampling glue (plain JAX) ---------------------
    def _sample_features_from_patches(self, proj_cf, labels, counts, key):
        # torch.multinomial over a 0/1 mask == uniform sampling w/o replacement,
        # implemented as Gumbel-top-k over masked scores.
        # TODO(synk): torch pads only up to the batch-max sample size (a
        # data-dependent output dim); here the static self.max_samples is used.
        B, D2, N = proj_cf.shape
        P, S = self.P, self.max_samples
        sizes = jnp.minimum(
            (counts.astype(jnp.float32) * self.sample_frac).astype(jnp.int32), S)
        mask = labels[:, None, :].astype(jnp.int32) == \
            jnp.arange(P, dtype=jnp.int32)[None, :, None]                 # [B, P, N]
        g = jax.random.gumbel(key, (B, P, N), jnp.float32)
        scores = jnp.where(mask, g, -jnp.inf)
        idx = jax.lax.top_k(scores, S)[1]                                 # [B, P, S]
        gathered = jax.vmap(lambda pb, ib: jnp.take(pb, ib, axis=1))(proj_cf, idx)
        gathered = jnp.transpose(gathered, (0, 2, 1, 3))                  # [B, P, D2, S]
        valid = jnp.arange(S)[None, None, :] < sizes[..., None]           # [B, P, S]
        samples = jnp.where(valid[:, :, None, :], gathered, 0.0)
        return samples, sizes

    # ------------------------- full forward ----------------------------------
    def forward(self, data, key):
        features, patch_labels = data                    # [B, C, H, W], [B, N]
        B, C, H, W = features.shape
        N = H * W
        x3 = features.reshape(B, C, N)                   # free reshape (stays NC(HW))
        labels3 = patch_labels.astype(jnp.int32).reshape(B, N, 1)
        proj_cf, emb_pad, cnt = self._fused(x3, labels3)
        patch_embeddings = jnp.transpose(emb_pad[:, :self.D2, :], (0, 2, 1))  # [B, P, D2]
        counts = cnt[:, 0, :].astype(jnp.int32)                               # [B, P]
        samples, samples_sizes = self._sample_features_from_patches(
            proj_cf, patch_labels, counts, key)
        return patch_embeddings, counts, samples, samples_sizes


if __name__ == "__main__":
    key = jax.random.PRNGKey(0)
    k_param, k_x, k_lbl, k_sample = jax.random.split(key, 4)

    B, C, H, W = 2, 4, 16, 16
    N = H * W
    D, D2, P = 32, 32, 8
    sample_frac, max_samples = 0.25, 16

    # n_tile=128 -> two N-tiles at N=256, exercising the accumulate/finalize path
    model = ElemPatchContrastModelPallas(
        in_channels=C, feat_dim=D, proj_dim=D2, num_patches=P,
        sample_frac=sample_frac, max_samples=max_samples, key=k_param, n_tile=128)

    x = jax.random.normal(k_x, (B, C, H, W), jnp.float32)
    patch_labels = jax.random.randint(k_lbl, (B, N), 0, P, jnp.int32)

    out = model.forward((x, patch_labels), k_sample)
    out = jax.block_until_ready(out)
    patch_embeddings, counts, samples, samples_sizes = out

    assert patch_embeddings.shape == (B, P, D2)
    assert counts.shape == (B, P)
    assert samples.shape == (B, P, D2, max_samples)
    assert samples_sizes.shape == (B, P)

    # --- lightweight correctness check against a plain-JAX f32 reference ----
    xf = jnp.transpose(x.reshape(B, C, N), (0, 2, 1))                    # [B, N, C]
    feat_ref = jnp.maximum(jnp.einsum("bnc,cd->bnd", xf, model.w1) + model.b1, 0.0)
    mask_ref = (patch_labels[:, None, :] ==
                jnp.arange(P)[None, :, None]).astype(jnp.float32)        # [B, P, N]
    counts_ref = jnp.sum(mask_ref, axis=-1)
    sums_ref = jnp.einsum("bpn,bnd->bpd", mask_ref, feat_ref)
    mean_ref = sums_ref / jnp.maximum(counts_ref, 1.0)[..., None]
    emb_ref = jnp.einsum("bpd,de->bpe", mean_ref, model.w2) + model.b2
    assert jnp.array_equal(counts, counts_ref.astype(jnp.int32)), "counts mismatch"
    err = float(jnp.max(jnp.abs(patch_embeddings - emb_ref)))
    assert err < 5e-2, f"patch_embeddings mismatch (max abs err {err})"

    print("KERNEL_OK")
</pallas_src>

<mosaic_0001>
module attributes {stable_mosaic.version = 11 : i64} {
  func.func @_fused_kernel(%arg0: i32, %arg1: i32, %arg2: memref<1x128x1xi32, #tpu.memory_space<vmem>>, %arg3: memref<1x4x128xf32, #tpu.memory_space<vmem>>, %arg4: memref<128x4xbf16, #tpu.memory_space<vmem>>, %arg5: memref<128x1xf32, #tpu.memory_space<vmem>>, %arg6: memref<128x128xbf16, #tpu.memory_space<vmem>>, %arg7: memref<1x32x128xf32, #tpu.memory_space<vmem>>, %arg8: memref<1x128x8xf32, #tpu.memory_space<vmem>>, %arg9: memref<1x1x8xf32, #tpu.memory_space<vmem>>, %arg10: memref<128x8xf32, #tpu.memory_space<vmem>>) attributes {dimension_semantics = [#tpu.dimension_semantics<parallel>, #tpu.dimension_semantics<arbitrary>], iteration_bounds = array<i64: 2, 2>, scalar_prefetch = 0 : i64, scratch_operands = 1 : i64, tpu.core_type = #tpu.core_type<tc>, window_params = [{transform_indices = @transform_0, window_bounds = array<i64: 1, 128, 1>}, {transform_indices = @transform_1, window_bounds = array<i64: 1, 4, 128>}, {pipeline_mode = #tpu.pipeline_mode<synchronous>, transform_indices = @transform_2, window_bounds = array<i64: 128, 4>}, {pipeline_mode = #tpu.pipeline_mode<synchronous>, transform_indices = @transform_3, window_bounds = array<i64: 128, 1>}, {pipeline_mode = #tpu.pipeline_mode<synchronous>, transform_indices = @transform_4, window_bounds = array<i64: 128, 128>}, {transform_indices = @transform_5, window_bounds = array<i64: 1, 32, 128>}, {transform_indices = @transform_6, window_bounds = array<i64: 1, 128, 8>}, {transform_indices = @transform_7, window_bounds = array<i64: 1, 1, 8>}]} {
    %c0 = arith.constant 0 : index
    %c0_0 = arith.constant 0 : index
    %c0_1 = arith.constant 0 : index
    %0 = vector.load %arg3[%c0, %c0_0, %c0_1] : memref<1x4x128xf32, #tpu.memory_space<vmem>>, vector<1x4x128xf32>
    %1 = vector.shape_cast %0 : vector<1x4x128xf32> to vector<4x128xf32>
    %2 = arith.truncf %1 : vector<4x128xf32> to vector<4x128xbf16>
    %c0_2 = arith.constant 0 : index
    %c0_3 = arith.constant 0 : index
    %3 = vector.load %arg4[%c0_2, %c0_3] : memref<128x4xbf16, #tpu.memory_space<vmem>>, vector<128x4xbf16>
    %cst = arith.constant dense<0.000000e+00> : vector<128x128xf32>
    %4 = tpu.matmul %3, %2, %cst {dimension_numbers = #tpu.dot_dimension_numbers<[1], [0], [0], [1], [0, 0, 1, 1], [], []>} : vector<128x4xbf16>, vector<4x128xbf16>, vector<128x128xf32> -> vector<128x128xf32>
    %c0_4 = arith.constant 0 : index
    %c0_5 = arith.constant 0 : index
    %5 = vector.load %arg5[%c0_4, %c0_5] : memref<128x1xf32, #tpu.memory_space<vmem>>, vector<128x1xf32>
    %6 = vector.broadcast %5 : vector<128x1xf32> to vector<128x128xf32>
    %7 = arith.addf %4, %6 : vector<128x128xf32>
    %cst_6 = arith.constant 0.000000e+00 : f32
    %8 = vector.broadcast %cst_6 : f32 to vector<128x128xf32>
    %9 = arith.maximumf %7, %8 : vector<128x128xf32>
    %10 = arith.truncf %9 : vector<128x128xf32> to vector<128x128xbf16>
    %c0_7 = arith.constant 0 : index
    %c0_8 = arith.constant 0 : index
    %11 = vector.load %arg6[%c0_7, %c0_8] : memref<128x128xbf16, #tpu.memory_space<vmem>>, vector<128x128xbf16>
    %cst_9 = arith.constant dense<0.000000e+00> : vector<128x128xf32>
    %12 = tpu.matmul %11, %10, %cst_9 {dimension_numbers = #tpu.dot_dimension_numbers<[1], [0], [0], [1], [0, 0, 1, 1], [], []>} : vector<128x128xbf16>, vector<128x128xbf16>, vector<128x128xf32> -> vector<128x128xf32>
    %13 = vector.extract_strided_slice %12 {offsets = [0, 0], sizes = [32, 128], strides = [1, 1]} : vector<128x128xf32> to vector<32x128xf32>
    %c0_10 = arith.constant 0 : index
    %c0_11 = arith.constant 0 : index
    %c0_12 = arith.constant 0 : index
    %14 = vector.load %arg7[%c0_10, %c0_11, %c0_12] : memref<1x32x128xf32, #tpu.memory_space<vmem>>, vector<1x32x128xf32>
    %15 = vector.shape_cast %14 : vector<1x32x128xf32> to vector<32x128xf32>
    %16 = vector.shape_cast %13 : vector<32x128xf32> to vector<1x32x128xf32>
    tpu.vector_store %arg7[%c0_10, %c0_11, %c0_12], %16 {strides = array<i32>} : memref<1x32x128xf32, #tpu.memory_space<vmem>>, vector<1x32x128xf32>,
    %c0_13 = arith.constant 0 : index
    %c0_14 = arith.constant 0 : index
    %c0_15 = arith.constant 0 : index
    %17 = vector.load %arg2[%c0_13, %c0_14, %c0_15] : memref<1x128x1xi32, #tpu.memory_space<vmem>>, vector<1x128x1xi32>
    %18 = vector.shape_cast %17 : vector<1x128x1xi32> to vector<128x1xi32>
    %19 = tpu.iota {dimensions = array<i32: 1>} : vector<128x8xi32>
    %20 = vector.broadcast %18 : vector<128x1xi32> to vector<128x8xi32>
    %21 = arith.cmpi eq, %20, %19 : vector<128x8xi32>
    %22 = arith.extui %21 : vector<128x8xi1> to vector<128x8xi32>
    %23 = arith.sitofp %22 : vector<128x8xi32> to vector<128x8xf32>
    %24 = arith.truncf %23 : vector<128x8xf32> to vector<128x8xbf16>
    %cst_16 = arith.constant dense<0.000000e+00> : vector<128x8xf32>
    %25 = tpu.matmul %10, %24, %cst_16 {dimension_numbers = #tpu.dot_dimension_numbers<[1], [0], [0], [1], [0, 0, 1, 1], [], []>} : vector<128x128xbf16>, vector<128x8xbf16>, vector<128x8xf32> -> vector<128x8xf32>
    %c0_i32 = arith.constant 0 : i32
    %26 = arith.cmpi eq, %arg1, %c0_i32 : i32
    %27 = arith.extui %26 : i1 to i32
    %c0_i32_17 = arith.constant 0 : i32
    %28 = arith.cmpi ne, %27, %c0_i32_17 : i32
    scf.if %28 {
      %cst_23 = arith.constant 0.000000e+00 : f32
      %35 = vector.broadcast %cst_23 : f32 to vector<128x8xf32>
      %c0_24 = arith.constant 0 : index
      %c0_25 = arith.constant 0 : index
      %36 = vector.load %arg10[%c0_24, %c0_25] : memref<128x8xf32, #tpu.memory_space<vmem>>, vector<128x8xf32>
      tpu.vector_store %arg10[%c0_24, %c0_25], %35 {strides = array<i32>} : memref<128x8xf32, #tpu.memory_space<vmem>>, vector<128x8xf32>,
    } else {
    }
    %c0_18 = arith.constant 0 : index
    %c0_19 = arith.constant 0 : index
    %29 = vector.load %arg10[%c0_18, %c0_19] : memref<128x8xf32, #tpu.memory_space<vmem>>, vector<128x8xf32>
    %30 = arith.addf %29, %25 : vector<128x8xf32>
    %c0_20 = arith.constant 0 : index
    %c0_21 = arith.constant 0 : index
    %31 = vector.load %arg10[%c0_20, %c0_21] : memref<128x8xf32, #tpu.memory_space<vmem>>, vector<128x8xf32>
    tpu.vector_store %arg10[%c0_20, %c0_21], %30 {strides = array<i32>} : memref<128x8xf32, #tpu.memory_space<vmem>>, vector<128x8xf32>,
    %c1_i32 = arith.constant 1 : i32
    %32 = arith.cmpi eq, %arg1, %c1_i32 : i32
    %33 = arith.extui %32 : i1 to i32
    %c0_i32_22 = arith.constant 0 : i32
    %34 = arith.cmpi ne, %33, %c0_i32_22 : i32
    scf.if %34 {
      %c0_23 = arith.constant 0 : index
      %c0_24 = arith.constant 0 : index
      %35 = vector.load %arg10[%c0_23, %c0_24] : memref<128x8xf32, #tpu.memory_space<vmem>>, vector<128x8xf32>
      %36 = vector.extract_strided_slice %35 {offsets = [127, 0], sizes = [1, 8], strides = [1, 1]} : vector<128x8xf32> to vector<1x8xf32>
      %cst_25 = arith.constant 0.000000e+00 : f32
      %37 = vector.broadcast %cst_25 : f32 to vector<1x8xf32>
      %38 = arith.cmpf oeq, %36, %37 : vector<1x8xf32>
      %cst_26 = arith.constant 1.000000e+00 : f32
      %39 = vector.broadcast %cst_26 : f32 to vector<1x8xf32>
      %40 = arith.select %38, %39, %36 : vector<1x8xi1>, vector<1x8xf32>
      %41 = vector.broadcast %40 : vector<1x8xf32> to vector<128x8xf32>
      %42 = arith.divf %35, %41 : vector<128x8xf32>
      %43 = tpu.iota {dimensions = array<i32: 0>} : vector<128x8xi32>
      %c127_i32 = arith.constant 127 : i32
      %44 = vector.broadcast %c127_i32 : i32 to vector<128x8xi32>
      %45 = arith.cmpi eq, %43, %44 : vector<128x8xi32>
      %cst_27 = arith.constant 1.000000e+00 : f32
      %46 = vector.broadcast %cst_27 : f32 to vector<128x8xf32>
      %47 = arith.select %45, %46, %42 : vector<128x8xi1>, vector<128x8xf32>
      %c0_28 = arith.constant 0 : index
      %c0_29 = arith.constant 0 : index
      %48 = vector.load %arg6[%c0_28, %c0_29] : memref<128x128xbf16, #tpu.memory_space<vmem>>, vector<128x128xbf16>
      %49 = arith.truncf %47 : vector<128x8xf32> to vector<128x8xbf16>
      %cst_30 = arith.constant dense<0.000000e+00> : vector<128x8xf32>
      %50 = tpu.matmul %48, %49, %cst_30 {dimension_numbers = #tpu.dot_dimension_numbers<[1], [0], [0], [1], [0, 0, 1, 1], [], []>} : vector<128x128xbf16>, vector<128x8xbf16>, vector<128x8xf32> -> vector<128x8xf32>
      %c0_31 = arith.constant 0 : index
      %c0_32 = arith.constant 0 : index
      %c0_33 = arith.constant 0 : index
      %51 = vector.load %arg8[%c0_31, %c0_32, %c0_33] : memref<1x128x8xf32, #tpu.memory_space<vmem>>, vector<1x128x8xf32>
      %52 = vector.shape_cast %51 : vector<1x128x8xf32> to vector<128x8xf32>
      %53 = vector.shape_cast %50 : vector<128x8xf32> to vector<1x128x8xf32>
      tpu.vector_store %arg8[%c0_31, %c0_32, %c0_33], %53 {strides = array<i32>} : memref<1x128x8xf32, #tpu.memory_space<vmem>>, vector<1x128x8xf32>,
      %c0_34 = arith.constant 0 : index
      %c0_35 = arith.constant 0 : index
      %c0_36 = arith.constant 0 : index
      %54 = vector.load %arg9[%c0_34, %c0_35, %c0_36] : memref<1x1x8xf32, #tpu.memory_space<vmem>>, vector<1x1x8xf32>
      %55 = vector.shape_cast %54 : vector<1x1x8xf32> to vector<1x8xf32>
      %56 = vector.shape_cast %36 : vector<1x8xf32> to vector<1x1x8xf32>
      tpu.vector_store %arg9[%c0_34, %c0_35, %c0_36], %56 {strides = array<i32>} : memref<1x1x8xf32, #tpu.memory_space<vmem>>, vector<1x1x8xf32>,
    } else {
    }
    return
  }
  func.func @transform_0(%arg0: i32, %arg1: i32) -> (i32, i32, i32) {
    %c0_i32 = arith.constant 0 : i32
    %c0_i32_0 = arith.constant 0 : i32
    return %arg0, %arg1, %c0_i32 : i32, i32, i32
  }
  func.func @transform_1(%arg0: i32, %arg1: i32) -> (i32, i32, i32) {
    %c0_i32 = arith.constant 0 : i32
    %c0_i32_0 = arith.constant 0 : i32
    return %arg0, %c0_i32, %arg1 : i32, i32, i32
  }
  func.func @transform_2(%arg0: i32, %arg1: i32) -> (i32, i32) {
    %c0_i32 = arith.constant 0 : i32
    %c0_i32_0 = arith.constant 0 : i32
    %c0_i32_1 = arith.constant 0 : i32
    return %c0_i32, %c0_i32_0 : i32, i32
  }
  func.func @transform_3(%arg0: i32, %arg1: i32) -> (i32, i32) {
    %c0_i32 = arith.constant 0 : i32
    %c0_i32_0 = arith.constant 0 : i32
    %c0_i32_1 = arith.constant 0 : i32
    return %c0_i32, %c0_i32_0 : i32, i32
  }
  func.func @transform_4(%arg0: i32, %arg1: i32) -> (i32, i32) {
    %c0_i32 = arith.constant 0 : i32
    %c0_i32_0 = arith.constant 0 : i32
    %c0_i32_1 = arith.constant 0 : i32
    return %c0_i32, %c0_i32_0 : i32, i32
  }
  func.func @transform_5(%arg0: i32, %arg1: i32) -> (i32, i32, i32) {
    %c0_i32 = arith.constant 0 : i32
    %c0_i32_0 = arith.constant 0 : i32
    return %arg0, %c0_i32, %arg1 : i32, i32, i32
  }
  func.func @transform_6(%arg0: i32, %arg1: i32) -> (i32, i32, i32) {
    %c0_i32 = arith.constant 0 : i32
    %c0_i32_0 = arith.constant 0 : i32
    %c0_i32_1 = arith.constant 0 : i32
    return %arg0, %c0_i32, %c0_i32_0 : i32, i32, i32
  }
  func.func @transform_7(%arg0: i32, %arg1: i32) -> (i32, i32, i32) {
    %c0_i32 = arith.constant 0 : i32
    %c0_i32_0 = arith.constant 0 : i32
    %c0_i32_1 = arith.constant 0 : i32
    return %arg0, %c0_i32, %c0_i32_0 : i32, i32, i32
  }
}

</mosaic_0001>

<bundles_post_ra>
// kernel: tpu_custom_call.1
= control target key start
LH: loop header
LB: loop body
LE: loop exit
PB: predicated region body
PF: predicated region fallthrough
CT: control target
= control target key end

     0   :  { %s2536_s0 = inlined_call_operand.vmem [shape: s32[2,256,1], index: 0, kind: input, shape index: {}]   ;;  %s2537_s1 = inlined_call_operand.vmem [shape: f32[2,4,256], index: 1, kind: input, shape index: {}]   ;;  %s2538_s2 = inlined_call_operand.vmem [shape: bf16[128,4], index: 2, kind: input, shape index: {}]   ;;  %s2539_s3 = inlined_call_operand.vmem [shape: f32[128,1], index: 3, kind: input, shape index: {}]   ;;  %s2540_s4 = inlined_call_operand.vmem [shape: bf16[128,128], index: 4, kind: input, shape index: {}]   ;;  %s2541_s5 = inlined_call_operand.hbm [shape: f32[2,32,256], index: 5, kind: output, shape index: {0}]   ;;  %s2542_s6 = inlined_call_operand.vmem [shape: f32[2,128,8], index: 6, kind: output, shape index: {1}]   ;;  %s2543_s7 = inlined_call_operand.hbm [shape: f32[2,1,8], index: 7, kind: output, shape index: {2}]  }
   0x1   :  { %2552 = sst [smem:[#allocation19_spill]] %s2536_s0 }
   0x2   :  { %2553 = sst [smem:[#allocation20_spill]] %s2537_s1 }
   0x3   :  { %13 = vsyncpa [#allocation4], 0 }
   0x4   :  { %15 = vsyncpa [#allocation4 + $0x1], 0 }
   0x5   :  { %16 = vsyncpa [#allocation6], 0 }
   0x6   :  { %18 = vsyncpa [#allocation6 + $0x1], 0  ;;  %s1928_s24 = smov 0   ;;  %s1930_s25 = smov 0  }
   0x7   :  { %s1932_s26 = smov 0   ;;  %s1934_s27 = smov 0  }
   0x8   :  { %s1936_s28 = smov 0   ;;  %s1938_s29 = smov 0  }
   0x9   :  { %s1940_s30 = smov 0   ;;  %s1942_s8 = smov 0  }
   0xa   :  { %s1944_s9 = smov 0   ;;  %s1946_s10 = smov 0  }
   0xb   :  { %s1948_s11 = smov 0  }
   0xc LB: > { %2554 = sst [smem:[#allocation9_spill]] %s1848_s26  ;;  %s1398_s12 = sadd.s32 4294967295, %s1880_s11   ;;  %s1880_s11 = sphi %s1948_s11, %s24_s11   ;;  %s1876_s10 = sphi %s1946_s10, %s2599_s10   ;;  %s1872_s9 = sphi %s1944_s9, %s2598_s9   ;;  %s1868_s8 = sphi %s1942_s8, %s2597_s8   ;;  %s1864_s30 = sphi %s1940_s30, %s2596_s30   ;;  %s1860_s29 = sphi %s1938_s29, %s2595_s29   ;;  %s1856_s28 = sphi %s1936_s28, %s2603_s28   ;;  %s1852_s27 = sphi %s1934_s27, %s2602_s27   ;;  %s1848_s26 = sphi %s1932_s26, %s2593_s26   ;;  %s1844_s25 = sphi %s1930_s25, %s2601_s25   ;;  %s1840_s24 = sphi %s1928_s24, %s2600_s24  }
   0xd   : > { %2555 = sst [smem:[#allocation10_spill]] %s1852_s27  ;;  %s1399_s13 = sadd.s32 4294967294, %s1880_s11  }
   0xe   : > { %2556 = sst [smem:[#allocation11_spill]] %s1860_s29  ;;  %s33_s14 = sadd.s32 1, %s1872_s9 }
   0xf   : > { %2557 = sst [smem:[#allocation12_spill]] %s1872_s9  ;;  %s36_s15 = sadd.s32 1, %s1876_s10 }
  0x10   : > { %2558 = sst [smem:[#allocation13_spill]] %s1876_s10  ;;  %p34_p0 = scmp.ge.s32.totalorder %s33_s14, 2 }
  0x11   : > { %s164_s16 = sadd.s32 1, %s1860_s29  ;;  %p174_p1 = scmp.ne.s32.totalorder %s1860_s29, %s1856_s28 }
  0x12   : > { %p1990_p2 = scmp.eq.s32.totalorder %s1398_s12, 3  ;;  %s2605_s14 = smov (%p34_p0, %s33_s14), 0 }
  0x13   : > { %2560 = sst [smem:[#allocation14_spill]] %s2605_s14  ;;  %s2607_s15 = smov (!%p34_p0, %s36_s15), %s1876_s10 }
  0x14   : > { %s160_s18 = ssub.s32 %s1872_s9, %s2605_s14  ;;  %p2001_p3 = por %p1990_p2, %p174_p1 }
  0x15   : > { %p38_p4 = scmp.ge.s32.totalorder %s2607_s15, 2  ;;  %p180_p5 = scmp.ne.s32.totalorder %s1856_s28, %s1852_s27 }
  0x16   : > { %p2007_p6 = scmp.eq.s32.totalorder %s1399_s13, 3  ;;  %s216_s21 = sadd.s32 1, %s1848_s26 }
  0x17   : > { %s2609_s15 = smov (%p38_p4, %s2607_s15), 0  ;;  %p226_p8 = scmp.ne.s32.totalorder %s1848_s26, %s1844_s25 }
  0x18   : > { %2563 = sst [smem:[#allocation15_spill]] %s2609_s15  ;;  %p2016_p7 = por %p2007_p6, %p180_p5 }
  0x19   : > { %s159_s23 = ssub.s32 %s1876_s10, %s2609_s15  ;;  %p232_p9 = scmp.ne.s32.totalorder %s1844_s25, %s1840_s24 }
  0x1a   : > { %s161_s12 = sor.u32 %s160_s18, %s159_s23  ;;  %p214_p10 = scmp.eq.s32.totalorder %s159_s23, 0 }
  0x1b   : > { %p162_p11 = scmp.eq.s32.totalorder %s161_s12, 0  ;;  %p2028_p12 = por %p226_p8, %p1990_p2 }
  0x1c   : > { %s2033_s14 = scalar_select %p214_p10, %s1848_s26, %s216_s21  }
  0x1d   : > { %s2036_s9 = scalar_select %p162_p11, %s1860_s29, %s164_s16  }
  0x1e   : > { %2566 = sst [smem:[#allocation16_spill]] %s2033_s14  ;;  %p2040_p13 = por %p232_p9, %p2007_p6 }
  0x1f   : > { %2567 = sst [smem:[#allocation17_spill]] %s2036_s9  ;;  %p1402_p0 = scmp.ge.s32.totalorder %s1880_s11, 1 }
  0x20   : > { %s2568_s27 = scalar_select %p2040_p13, 1, 0 }
  0x21   : > { %p284_p1 = scmp.lt.s32.totalorder %s1880_s11, 5 }
  0x22   : > { %2569 = sst [smem:[#allocation18_spill]] %s2568_s27 }
  0x23   : > { %p285_p4 = pnand %p1402_p0, %p284_p1 }
  0x24   : > { %s1404_s17 = sshll.u32 (!%p285_p4), %s1864_s30, 4  ;;  %p338_p2 = scmp.lt.s32.totalorder (!%p285_p4), %s1868_s8, 1 }
  0x25   : > { %288 = sbr.rel (%p285_p4) target bundleno = 849 (0x351), region = 40  ;;  %p340_p5 = scmp.lt.s32.totalorder (!%p285_p4), %s1404_s17, 31 }
  0x26   : > { %s2570_s0 = sld [smem:[#allocation19_spill]] (!%p285_p4)  ;;  %p349_p6 = scmp.lt.s32.totalorder (!%p285_p4), %s1864_s30, 1 }
  0x27   : > { %s2571_s1 = sld [smem:[#allocation20_spill]] (!%p285_p4)  ;;  %s321_s14 = sand.u32 (!%p285_p4), 1, %s1856_s28  }
  0x28   : > { %s2588_s16 = sand.u32 (!%p285_p4), 1, %s1844_s25   ;;  %p1515_p8 = scmp.ne.s32.totalorder (!%p285_p4), %s1864_s30, 0 }
  0x2a   : > { %v393_v0 = vld [vmem:[%s2539_s3 + $0x70] sm:$0xff]  ;;  %v1882_v1 = vmov 0   ;;  %s339_s20 = scalar_select %p338_p2, %s1868_s8, 1  ;;  %v394_v2 = vld [vmem:[%s2539_s3 + $0x78] sm:$0xff]  ;;  %vm540_vm0 = vcmask 1041408   ;;  %v392_v9 = vld [vmem:[%s2539_s3 + $0x68] sm:$0xff]  ;;  %v738_v53 = vlaneseq }
  0x2b   : > { %1725 = vset.pattern.permute.xlu1 %v1882_v1  ;;  %1727 = vset.pattern.permute.xlu2 %v1882_v1  ;;  %s2611_s17 = smov (!%p340_p5, %s1404_s17), 31  ;;  %v1555_v11 = vld [vmem:[%s2538_s2] sm:$0xff]  ;;  %vm515_vm1 = vcmask 31744   ;;  %v389_v14 = vld [vmem:[%s2539_s3 + $0x50] sm:$0xff]  ;;  %v390_v16 = vld [vmem:[%s2539_s3 + $0x58] sm:$0xff] }
  0x2c   : > { %467 = vperm.xlu1 %1725, %v393_v0   ;;  %1726 = vset.pattern.permute.xlu0 %v1882_v1  ;;  %s1405_s21 = sshll.u32 %s339_s20, 5  ;;  %s1554_s12 = sshll.u32 %s339_s20, 7  ;;  %v391_v12 = vld [vmem:[%s2539_s3 + $0x60] sm:$0xff]  ;;  %v1556_v18 = vld [vmem:[%s2538_s2 + $0x8] sm:$0xff]  ;;  %v386_v24 = vld [vmem:[%s2539_s3 + $0x38] sm:$0xff]  ;;  %v2174_v56 = vand.u32 127, %v738_v53 }
  0x2d   : > { %s343_s18 = sadd.s32 %s1405_s21, %s2611_s17  ;;  %s2056_s10 = scalar_lea.vmem %s2542_s6, %s1554_s12  ;;  %v387_v19 = vld [vmem:[%s2539_s3 + $0x40] sm:$0xff]  ;;  %v388_v22 = vld [vmem:[%s2539_s3 + $0x48] sm:$0xff]  ;;  %v1557_v25 = vld [vmem:[%s2538_s2 + $0x10] sm:$0xff]  ;;  %v1883_v62 = vmov 1.0|1.0  }
  0x2e   : > { %s1406_s9 = sshll.u32 %s343_s18, 3  ;;  %s1407_s15 = sshll.u32 %s339_s20, 1  ;;  %v385_v26 = vld [vmem:[%s2539_s3 + $0x30] sm:$0xff]  ;;  %v383_v28 = vld [vmem:[%s2539_s3 + $0x20] sm:$0xff]  ;;  %v384_v30 = vld [vmem:[%s2539_s3 + $0x28] sm:$0xff] }
  0x2f   : > { %s2061_s26 = scalar_lea.vmem %s2570_s0, %s1406_s9  ;;  %v1558_v32 = vld [vmem:[%s2538_s2 + $0x18] sm:$0xff]  ;;  %v381_v33 = vld [vmem:[%s2539_s3 + $0x10] sm:$0xff]  ;;  %v379_v35 = vld [vmem:[%s2539_s3] sm:$0xff]  ;;  %s2351_s20 = scalar_lea.vmem [#allocation5], %s2588_s16 }
  0x30   : > { %v736_v3 = vld [vmem:[%s2061_s26 + $0x70] sm:$0xff]  ;;  %v734_v4 = vld [vmem:[%s2061_s26 + $0x60] sm:$0xff]  ;;  %s350_s17 = scalar_select %p349_p6, %s1864_s30, 1  ;;  %v737_v6 = vld [vmem:[%s2061_s26 + $0x78] sm:$0xff] }
  0x31   : > { %783 = vperm.xlu0 %1726, %v736_v3   ;;  %777 = vperm.xlu2 %1727, %v734_v4   ;;  %v735_v7 = vld [vmem:[%s2061_s26 + $0x68] sm:$0xff]  ;;  %v732_v13 = vld [vmem:[%s2061_s26 + $0x50] sm:$0xff]  ;;  %v733_v15 = vld [vmem:[%s2061_s26 + $0x58] sm:$0xff] }
  0x32   : > { %s352_s21 = sadd.s32 %s1407_s15, %s350_s17  ;;  %v731_v17 = vld [vmem:[%s2061_s26 + $0x48] sm:$0xff]  ;;  %v730_v20 = vld [vmem:[%s2061_s26 + $0x40] sm:$0xff]  ;;  %v728_v21 = vld [vmem:[%s2061_s26 + $0x30] sm:$0xff] }
  0x33   : > { %s1408_s29 = sshll.u32 %s352_s21, 2  ;;  %v729_v23 = vld [vmem:[%s2061_s26 + $0x38] sm:$0xff]  ;;  %v726_v27 = vld [vmem:[%s2061_s26 + $0x20] sm:$0xff]  ;;  %v727_v29 = vld [vmem:[%s2061_s26 + $0x28] sm:$0xff] }
  0x34   : > { %472 = vperm.xlu1 %1725, %v394_v2   ;;  %s354_s12 = scalar_lea.vmem %s2571_s1, %s1408_s29  ;;  %v725_v31 = vld [vmem:[%s2061_s26 + $0x18] sm:$0xff]  ;;  %v724_v34 = vld [vmem:[%s2061_s26 + $0x10] sm:$0xff]  ;;  %v380_v36 = vld [vmem:[%s2539_s3 + $0x8] sm:$0xff] }
  0x35   : > { %v361_v5 = vld [vmem:[%s354_s12] sm:$0xf]  ;;  %v382_v37 = vld [vmem:[%s2539_s3 + $0x18] sm:$0xff]  ;;  %v723_v38 = vld [vmem:[%s2061_s26 + $0x8] sm:$0xff]  ;;  %s1403_s12 = sshll.u32 %s321_s14, 5 }
  0x36   : > { %v362_v8 = vpack.c.bf16 %v361_v5, %v361_v5  ;;  %v1559_v39 = vld [vmem:[%s2538_s2 + $0x20] sm:$0xff]  ;;  %v1560_v41 = vld [vmem:[%s2538_s2 + $0x28] sm:$0xff]  ;;  %v1561_v43 = vld [vmem:[%s2538_s2 + $0x30] sm:$0xff]  ;;  %s2335_s27 = scalar_lea.vmem [#allocation3], %s1403_s12 }
  0x37   : > { %v722_v40 = vld [vmem:[%s2061_s26] sm:$0xff]  ;;  %v1562_v49 = vld [vmem:[%s2538_s2 + $0x38] sm:$0xff]  ;;  %v1565_v63 = vld [vmem:[%s2540_s4 + $0x10] sm:$0xff] }
  0x38   : > { %v542_v10 = vsel %vm540_vm0, %v362_v8, 0  ;;  %v1570_v61 = vld [vmem:[%s2540_s4 + $0x38] sm:$0xff] }
  0x39   : > { %786 = vperm.xlu0 %1726, %v737_v6   ;;  %780 = vperm.xlu2 %1727, %v735_v7   ;;  %v1566_v5 = vld [vmem:[%s2540_s4 + $0x18] sm:$0xff] }
  0x3a   : > { %551 = vmatpush.bf16.msra.mxu0 %v542_v10 }
  0x3c   : > { %462 = vperm.xlu1 %1725, %v392_v9  }
  0x3d   : > { %1443 = vmatmul.msk.bf16.vlgmr.msra.gmra.mxu0 %vm515_vm1, %v1555_v11 }
  0x41   : > { %457 = vperm.xlu0 %1726, %v391_v12   ;;  %771 = vperm.xlu2 %1727, %v732_v13  }
  0x44   : > { %447 = vperm.xlu1 %1725, %v389_v14  }
  0x49   : > { %774 = vperm.xlu0 %1726, %v733_v15   ;;  %452 = vperm.xlu2 %1727, %v390_v16  }
  0x4c   : > { %768 = vperm.xlu1 %1725, %v731_v17  }
  0x4d   : > { %1444 = vmatmul.msk.bf16.gmra.mxu0 %vm515_vm1, %v1556_v18 }
  0x51   : > { %437 = vperm.xlu2 %1727, %v387_v19   ;;  %765 = vperm.xlu0 %1726, %v730_v20  }
  0x54   : > { %759 = vperm.xlu1 %1725, %v728_v21  }
  0x59   : > { %442 = vperm.xlu0 %1726, %v388_v22   ;;  %762 = vperm.xlu2 %1727, %v729_v23  }
  0x5c   : > { %432 = vperm.xlu1 %1725, %v386_v24  }
  0x5d   : > { %1445 = vmatmul.msk.bf16.gmra.mxu0 %vm515_vm1, %v1557_v25 }
  0x61   : > { %427 = vperm.xlu0 %1726, %v385_v26   ;;  %753 = vperm.xlu2 %1727, %v726_v27  }
  0x64   : > { %417 = vperm.xlu1 %1725, %v383_v28  }
  0x69   : > { %756 = vperm.xlu0 %1726, %v727_v29   ;;  %422 = vperm.xlu2 %1727, %v384_v30  }
  0x6c   : > { %750 = vperm.xlu1 %1725, %v725_v31  }
  0x6d   : > { %1446 = vmatmul.msk.bf16.gmra.mxu0 %vm515_vm1, %v1558_v32 }
  0x71   : > { %407 = vperm.xlu2 %1727, %v381_v33   ;;  %747 = vperm.xlu0 %1726, %v724_v34  }
  0x74   : > { %397 = vperm.xlu1 %1725, %v379_v35  }
  0x79   : > { %402 = vperm.xlu2 %1727, %v380_v36   ;;  %412 = vperm.xlu0 %1726, %v382_v37  }
  0x7c   : > { %744 = vperm.xlu1 %1725, %v723_v38  }
  0x7d   : > { %1447 = vmatmul.msk.bf16.gmra.mxu0 %vm515_vm1, %v1559_v39 }
  0x81   : > { %741 = vperm.xlu0 %1726, %v722_v40  }
  0x8b   : > { %v778_v42 = vpop.permute.xlu2 %777 }
  0x8c   : > { %vm800_vm4 = vcmp.eq.s32.totalorder %v778_v42, %v2174_v56 }
  0x8d   : > { %1448 = vmatmul.msk.bf16.gmra.mxu0 %vm515_vm1, %v1560_v41 }
  0x93   : > { %v781_v45 = vpop.permute.xlu2 %780 }
  0x94   : > { %vm801_vm5 = vcmp.eq.s32.totalorder %v781_v45, %v2174_v56 }
  0x95   : > { %vm2189_vm7 = vmpackc.low %vm801_vm5, %vm800_vm4 }
  0x9b   : > { %v772_v48 = vpop.permute.xlu2 %771 }
  0x9c   : > { %vm798_vm8 = vcmp.eq.s32.totalorder %v772_v48, %v2174_v56 }
  0x9d   : > { %1449 = vmatmul.msk.bf16.gmra.mxu0 %vm515_vm1, %v1561_v43 }
  0x9e   : > { %v2156_v44 = vpop.permute.xlu1 %467 }
  0xa3   : > { %v784_v46 = vpop.permute.xlu0 %783  ;;  %v2167_v52 = vpop.permute.xlu2 %452 }
  0xa4   : > { %vm802_vm2 = vcmp.eq.s32.totalorder %v784_v46, %v2174_v56 }
  0xa6   : > { %v2159_v47 = vpop.permute.xlu1 %472 }
  0xab   : > { %v787_v50 = vpop.permute.xlu0 %786  ;;  %v2178_v59 = vpop.permute.xlu2 %437 }
  0xac   : > { %vm803_vm3 = vcmp.eq.s32.totalorder %v787_v50, %v2174_v56 }
  0xad   : > { %1450 = vmatmul.msk.bf16.gmra.mxu0 %vm515_vm1, %v1562_v49  ;;  %vm2182_vm6 = vmpackc.low %vm803_vm3, %vm802_vm2 }
  0xae   : > { %v2164_v51 = vpop.permute.xlu1 %462  ;;  %1500 = vmatpush.bf16.msk.msra.mxu2 %vm2182_vm6, %v1883_v62 }
  0xb2   : > { %1502 = vmatpush.bf16.msk.msra.mxu2 %vm2189_vm7, %v1883_v62 }
  0xb3   : > { %v2169_v54 = vpop.permute.xlu0 %457  ;;  %v763_v4 = vpop.permute.xlu2 %762 }
  0xb4   : > { %vm795_vm14 = vcmp.eq.s32.totalorder %v763_v4, %v2174_v56 }
  0xb6   : > { %v2171_v55 = vpop.permute.xlu1 %447 }
  0xba   : > { %v553_v57 = vpop.f32.mrf.mxu0 }
  0xbb   : > { %v775_v58 = vpop.permute.xlu0 %774  ;;  %v754_v10 = vpop.permute.xlu2 %753 }
  0xbc   : > { %vm799_vm9 = vcmp.eq.s32.totalorder %v775_v58, %v2174_v56  ;;  %vm792_vm1 = vcmp.eq.s32.totalorder %v754_v10, %v2174_v56 }
  0xbd   : > { %vm2198_vm10 = vmpackc.low %vm799_vm9, %vm798_vm8 }
  0xbe   : > { %v769_v60 = vpop.permute.xlu1 %768  ;;  %1504 = vmatpush.bf16.msk.msra.mxu2 %vm2198_vm10, %v1883_v62 }
  0xbf   : > { %vm797_vm11 = vcmp.eq.s32.totalorder %v769_v60, %v2174_v56 }
  0xc2   : > { %v555_v0 = vpop.f32.mrf.mxu0 }
  0xc3   : > { %v766_v1 = vpop.permute.xlu0 %765  ;;  %v423_v14 = vpop.permute.xlu2 %422 }
  0xc4   : > { %vm796_vm12 = vcmp.eq.s32.totalorder %v766_v1, %v2174_v56 }
  0xc5   : > { %vm2207_vm13 = vmpackc.low %vm797_vm11, %vm796_vm12 }
  0xc6   : > { %v760_v3 = vpop.permute.xlu1 %759  ;;  %1506 = vmatpush.bf16.msk.msra.mxu2 %vm2207_vm13, %v1883_v62 }
  0xc7   : > { %vm794_vm15 = vcmp.eq.s32.totalorder %v760_v3, %v2174_v56 }
  0xc8   : > { %vm2218_vm0 = vmpackc.low %vm795_vm14, %vm794_vm15 }
  0xca   : > { %v558_v6 = vpop.f32.mrf.mxu0  ;;  %1508 = vmatpush.bf16.msk.msra.mxu2 %vm2218_vm0, %v1883_v62 }
  0xcb   : > { %v2213_v7 = vpop.permute.xlu0 %442  ;;  %v408_v21 = vpop.permute.xlu2 %407 }
  0xcc   : > { %v559_v43 = vadd.f32 %v558_v6, %v408_v21 }
  0xce   : > { %v433_v9 = vpop.permute.xlu1 %432  ;;  %v595_v48 = vmax.f32 %v559_v43, 0.0 }
  0xd2   : > { %v560_v11 = vpop.f32.mrf.mxu0 }
  0xd3   : > { %v428_v12 = vpop.permute.xlu0 %427  ;;  %v403_v26 = vpop.permute.xlu2 %402 }
  0xd4   : > { %v556_v29 = vadd.f32 %v555_v0, %v403_v26  ;;  %v1564_v26 = vld [vmem:[%s2540_s4 + $0x8] sm:$0xff] }
  0xd6   : > { %v418_v13 = vpop.permute.xlu1 %417  ;;  %v594_v35 = vmax.f32 %v556_v29, 0.0 }
  0xda   : > { %v563_v15 = vpop.f32.mrf.mxu0 }
  0xdb   : > { %v757_v16 = vpop.permute.xlu0 %756 }
  0xdc   : > { %vm793_vm2 = vcmp.eq.s32.totalorder %v757_v16, %v2174_v56 }
  0xdd   : > { %vm2227_vm3 = vmpackc.low %vm793_vm2, %vm792_vm1 }
  0xde   : > { %v751_v18 = vpop.permute.xlu1 %750  ;;  %1510 = vmatpush.bf16.msk.msra.mxu2 %vm2227_vm3, %v1883_v62 }
  0xdf   : > { %vm791_vm4 = vcmp.eq.s32.totalorder %v751_v18, %v2174_v56 }
  0xe2   : > { %v565_v19 = vpop.f32.mrf.mxu0 }
  0xe3   : > { %v748_v20 = vpop.permute.xlu0 %747 }
  0xe4   : > { %vm790_vm5 = vcmp.eq.s32.totalorder %v748_v20, %v2174_v56 }
  0xe5   : > { %vm2236_vm8 = vmpackc.low %vm791_vm4, %vm790_vm5 }
  0xe6   : > { %1512 = vmatpush.bf16.msk.msra.mxu2 %vm2236_vm8, %v1883_v62  ;;  %v398_v23 = vpop.permute.xlu1 %397 }
  0xe7   : > { %v554_v27 = vadd.f32 %v553_v57, %v398_v23  ;;  %v564_v57 = vadd.f32 %v563_v15, %v418_v13 }
  0xe9   : > { %v593_v32 = vmax.f32 %v554_v27, 0.0  ;;  %v597_v0 = vmax.f32 %v564_v57, 0.0 }
  0xea   : > { %v568_v24 = vpop.f32.mrf.mxu0 }
  0xeb   : > { %v413_v25 = vpop.permute.xlu0 %412  ;;  %v569_v30 = vadd.f32 %v568_v24, %v428_v12  ;;  %v609_v39 = vpack.c.bf16 %v594_v35, %v593_v32 }
  0xec   : > { %v561_v42 = vadd.f32 %v560_v11, %v413_v25 }
  0xed   : > { %v599_v36 = vmax.f32 %v569_v30, 0.0 }
  0xee   : > { %v745_v28 = vpop.permute.xlu1 %744  ;;  %v596_v46 = vmax.f32 %v561_v42, 0.0 }
  0xef   : > { %vm789_vm9 = vcmp.eq.s32.totalorder %v745_v28, %v2174_v56  ;;  %v1568_v28 = vld [vmem:[%s2540_s4 + $0x28] sm:$0xff] }
  0xf0   : > { %v610_v49 = vpack.c.bf16 %v596_v46, %v595_v48 }
  0xf2   : > { %v570_v31 = vpop.f32.mrf.mxu0 }
  0xf3   : > { %v571_v33 = vadd.f32 %v570_v31, %v433_v9  ;;  %v742_v34 = vpop.permute.xlu0 %741 }
  0xf4   : > { %vm788_vm11 = vcmp.eq.s32.totalorder %v742_v34, %v2174_v56  ;;  %v566_v56 = vadd.f32 %v565_v19, %v423_v14 }
  0xf5   : > { %v600_v37 = vmax.f32 %v571_v33, 0.0  ;;  %vm2245_vm12 = vmpackc.low %vm789_vm9, %vm788_vm11 }
  0xf6   : > { %1514 = vmatpush.bf16.msk.msra.mxu2 %vm2245_vm12, %v1883_v62  ;;  %v598_v60 = vmax.f32 %v566_v56, 0.0 }
  0xf7   : > { %v612_v40 = vpack.c.bf16 %v600_v37, %v599_v36 }
  0xf8   : > { %v611_v1 = vpack.c.bf16 %v598_v60, %v597_v0 }
  0xf9   : > { %852 = vmatmul.bf16.vlgmr.msra.gmra.mxu2 %v609_v39 }
  0xfa   : > { %v573_v41 = vpop.f32.mrf.mxu0 }
  0xfb   : > { %v574_v11 = vadd.f32 %v573_v41, %v2178_v59 }
  0xfd   : > { %v601_v20 = vmax.f32 %v574_v11, 0.0 }
 0x102   : > { %v575_v45 = vpop.f32.mrf.mxu0 }
 0x103   : > { %v576_v10 = vadd.f32 %v575_v45, %v2213_v7 }
 0x105   : > { %v602_v14 = vmax.f32 %v576_v10, 0.0 }
 0x107   : > { %v613_v7 = vpack.c.bf16 %v602_v14, %v601_v20 }
 0x109   : > { %857 = vmatmul.bf16.gmra.mxu2 %v610_v49 }
 0x10a   : > { %v578_v50 = vpop.f32.mrf.mxu0 }
 0x112   : > { %v580_v58 = vpop.f32.mrf.mxu0 }
 0x113   : > { %v581_v21 = vadd.f32 %v580_v58, %v2167_v52  ;;  %v1563_v52 = vld [vmem:[%s2540_s4] sm:$0xff] }
 0x119   : > { %862 = vmatmul.bf16.gmra.mxu2 %v611_v1 }
 0x11a   : > { %v583_v3 = vpop.f32.mrf.mxu0 }
 0x11b   : > { %v584_v15 = vadd.f32 %v583_v3, %v2169_v54 }
 0x11d   : > { %v605_v25 = vmax.f32 %v584_v15, 0.0 }
 0x122   : > { %v585_v4 = vpop.f32.mrf.mxu0 }
 0x123   : > { %v586_v16 = vadd.f32 %v585_v4, %v2164_v51  ;;  %v604_v51 = vmax.f32 %v581_v21, 0.0 }
 0x125   : > { %v606_v23 = vmax.f32 %v586_v16, 0.0 }
 0x127   : > { %v615_v59 = vpack.c.bf16 %v606_v23, %v605_v25 }
 0x129   : > { %867 = vmatmul.bf16.gmra.mxu2 %v612_v40 }
 0x12a   : > { %v588_v9 = vpop.f32.mrf.mxu0 }
 0x12b   : > { %v589_v6 = vadd.f32 %v588_v9, %v2156_v44  ;;  %v579_v44 = vadd.f32 %v578_v50, %v2171_v55  ;;  %v1569_v55 = vld [vmem:[%s2540_s4 + $0x30] sm:$0xff] }
 0x12d   : > { %v607_v18 = vmax.f32 %v589_v6, 0.0 }
 0x132   : > { %v590_v12 = vpop.f32.mrf.mxu0 }
 0x133   : > { %v591_v13 = vadd.f32 %v590_v12, %v2159_v47  ;;  %v603_v47 = vmax.f32 %v579_v44, 0.0 }
 0x135   : > { %v608_v19 = vmax.f32 %v591_v13, 0.0  ;;  %v614_v54 = vpack.c.bf16 %v604_v51, %v603_v47 }
 0x137   : > { %v616_v24 = vpack.c.bf16 %v608_v19, %v607_v18 }
 0x139   : > { %681 = vmatpush.bf16.msra.mxu1 %v616_v24  ;;  %1579 = vmatpush.bf16.msra.mxu3 %v616_v24 }
 0x13a   : > { %872 = vmatmul.bf16.gmra.mxu2 %v613_v7 }
 0x13d   : > { %682 = vmatpush.bf16.msra.mxu1 %v615_v59  ;;  %1580 = vmatpush.bf16.msra.mxu3 %v615_v59 }
 0x141   : > { %683 = vmatpush.bf16.msra.mxu1 %v614_v54  ;;  %1581 = vmatpush.bf16.msra.mxu3 %v614_v54 }
 0x145   : > { %684 = vmatpush.bf16.msra.mxu1 %v613_v7  ;;  %1582 = vmatpush.bf16.msra.mxu3 %v613_v7 }
 0x149   : > { %685 = vmatpush.bf16.msra.mxu1 %v612_v40  ;;  %1583 = vmatpush.bf16.msra.mxu3 %v612_v40 }
 0x14a   : > { %877 = vmatmul.bf16.gmra.mxu2 %v614_v54 }
 0x14d   : > { %686 = vmatpush.bf16.msra.mxu1 %v611_v1  ;;  %1584 = vmatpush.bf16.msra.mxu3 %v611_v1 }
 0x151   : > { %687 = vmatpush.bf16.msra.mxu1 %v610_v49  ;;  %1585 = vmatpush.bf16.msra.mxu3 %v610_v49 }
 0x155   : > { %688 = vmatpush.bf16.msra.mxu1 %v609_v39  ;;  %1586 = vmatpush.bf16.msra.mxu3 %v609_v39 }
 0x158   : > { %689 = vmatmul.bf16.vlgmr.msra.gmra.mxu1 %v1563_v52  ;;  %711 = vmatmul.bf16.vlgmr.msra.gmra.mxu3 %v1569_v55 }
 0x159   : > { %1587 = vmatpush.bf16.msk.msrb.mxu3 %vm2182_vm6, %v1883_v62 }
 0x15d   : > { %1588 = vmatpush.bf16.msk.msrb.mxu3 %vm2189_vm7, %v1883_v62 }
 0x161   : > { %1589 = vmatpush.bf16.msk.msrb.mxu3 %vm2198_vm10, %v1883_v62 }
 0x165   : > { %1590 = vmatpush.bf16.msk.msrb.mxu3 %vm2207_vm13, %v1883_v62 }
 0x168   : > { %694 = vmatmul.bf16.gmra.mxu1 %v1564_v26  ;;  %714 = vmatmul.bf16.gmra.mxu3 %v1570_v61 }
 0x169   : > { %1591 = vmatpush.bf16.msk.msrb.mxu3 %vm2218_vm0, %v1883_v62 }
 0x16d   : > { %1592 = vmatpush.bf16.msk.msrb.mxu3 %vm2227_vm3, %v1883_v62 }
 0x171   : > { %1593 = vmatpush.bf16.msk.msrb.mxu3 %vm2236_vm8, %v1883_v62 }
 0x175   : > { %1594 = vmatpush.bf16.msk.msrb.mxu3 %vm2245_vm12, %v1883_v62  ;;  %v1567_v62 = vld [vmem:[%s2540_s4 + $0x20] sm:$0xff] }
 0x178   : > { %699 = vmatmul.bf16.gmra.mxu1 %v1565_v63  ;;  %882 = vmatmul.bf16.vlgmr.msrb.gmra.mxu3 %v615_v59 }
 0x17c   : > { %v2299_v2 = vpop.f32.mrf.mxu2 }
 0x184   : > { %v2304_v8 = vpop.f32.mrf.mxu2 }
 0x188   : > { %702 = vmatmul.bf16.gmra.mxu1 %v1566_v5  ;;  %887 = vmatmul.bf16.gmra.mxu3 %v616_v24 }
 0x18c   : > { %v2306_v17 = vpop.f32.mrf.mxu2 }
 0x194   : > { %v2311_v22 = vpop.f32.mrf.mxu2 }
 0x198   : > { %705 = vmatmul.bf16.gmra.mxu1 %v1567_v62 }
 0x19c   : > { %v2313_v27 = vpop.f32.mrf.mxu2 }
 0x1a4   : > { %v2318_v29 = vpop.f32.mrf.mxu2 }
 0x1a8   : > { %708 = vmatmul.bf16.gmra.mxu1 %v1568_v28 }
 0x1ac   : > { %v2320_v30 = vpop.f32.mrf.mxu2 }
 0x1b4   : > { %v2322_v31 = vpop.f32.mrf.mxu2 }
 0x1bd   : > { %v2324_v32 = vpop.f32.mrf.mxu2 }
 0x1c5   : > { %v2326_v33 = vpop.f32.mrf.mxu2 }
 0x1cd   : > { %v2328_v34 = vpop.f32.mrf.mxu2 }
 0x1d5   : > { %v690_v35 = vpop.f32.mrf.mxu1  ;;  %v2333_v36 = vpop.f32.mrf.mxu2 }
 0x1d6   : > { %718 = vst [vmem:[%s2335_s27] sm:$0xff] %v690_v35 }
 0x1db   : > { %v712_v37 = vpop.f32.mrf.mxu3 }
 0x1dd   : > { %v692_v38 = vpop.f32.mrf.mxu1 }
 0x1de   : > { %719 = vst [vmem:[%s2335_s27 + $0x8] sm:$0xff] %v692_v38 }
 0x1e3   : > { %v713_v39 = vpop.f32.mrf.mxu3 }
 0x1e5   : > { %v695_v40 = vpop.f32.mrf.mxu1 }
 0x1e6   : > { %720 = vst [vmem:[%s2335_s27 + $0x10] sm:$0xff] %v695_v40 }
 0x1eb   : > { %v715_v41 = vpop.f32.mrf.mxu3 }
 0x1ed   : > { %v697_v42 = vpop.f32.mrf.mxu1 }
 0x1ee   : > { %721 = vst [vmem:[%s2335_s27 + $0x18] sm:$0xff] %v697_v42 }
 0x1f3   : > { %v716_v43 = vpop.f32.mrf.mxu3 }
 0x1f5   : > { %v700_v45 = vpop.f32.mrf.mxu1 }
 0x1fb   : > { %v2341_v46 = vpop.f32.mrf.mxu3 }
 0x1fd   : > { %v701_v48 = vpop.f32.mrf.mxu1 }
 0x203   : > { %v2343_v49 = vpop.f32.mrf.mxu3 }
 0x205   : > { %v703_v50 = vpop.f32.mrf.mxu1 }
 0x20b   : > { %v2345_v56 = vpop.f32.mrf.mxu3 }
 0x20d   : > { %v704_v57 = vpop.f32.mrf.mxu1 }
 0x213   : > { %v2347_v58 = vpop.f32.mrf.mxu3 }
 0x215   : > { %v706_v60 = vpop.f32.mrf.mxu1 }
 0x21d   : > { %v707_v0 = vpop.f32.mrf.mxu1 }
 0x225   : > { %v709_v1 = vpop.f32.mrf.mxu1 }
 0x229   : > { %896 = sbr.rel (%p1515_p8) target bundleno = 575 (0x23f), region = 44 }
 0x22d   : > { %v710_v3 = vpop.f32.mrf.mxu1 }
 0x22e   : > { %vm897_vm6 = vcmask 64512   ;;  %v1884_v4 = vmov 0.0  }
 0x22f   : > { %898 = vst.msk [vmem:[#allocation2] sm:$0xff] %vm897_vm6, %v1884_v4 }
 0x230   : > { %899 = vst.msk [vmem:[#allocation2 + $0x8] sm:$0xff] %vm897_vm6, %v1884_v4 }
 0x231   : > { %900 = vst.msk [vmem:[#allocation2 + $0x10] sm:$0xff] %vm897_vm6, %v1884_v4 }
 0x232   : > { %901 = vst.msk [vmem:[#allocation2 + $0x18] sm:$0xff] %vm897_vm6, %v1884_v4 }
 0x233   : > { %902 = vst.msk [vmem:[#allocation2 + $0x20] sm:$0xff] %vm897_vm6, %v1884_v4 }
 0x234   : > { %903 = vst.msk [vmem:[#allocation2 + $0x28] sm:$0xff] %vm897_vm6, %v1884_v4 }
 0x235   : > { %904 = vst.msk [vmem:[#allocation2 + $0x30] sm:$0xff] %vm897_vm6, %v1884_v4 }
 0x236   : > { %905 = vst.msk [vmem:[#allocation2 + $0x38] sm:$0xff] %vm897_vm6, %v1884_v4 }
 0x237   : > { %906 = vst.msk [vmem:[#allocation2 + $0x40] sm:$0xff] %vm897_vm6, %v1884_v4 }
 0x238   : > { %907 = vst.msk [vmem:[#allocation2 + $0x48] sm:$0xff] %vm897_vm6, %v1884_v4 }
 0x239   : > { %908 = vst.msk [vmem:[#allocation2 + $0x50] sm:$0xff] %vm897_vm6, %v1884_v4 }
 0x23a   : > { %909 = vst.msk [vmem:[#allocation2 + $0x58] sm:$0xff] %vm897_vm6, %v1884_v4 }
 0x23b   : > { %910 = vst.msk [vmem:[#allocation2 + $0x60] sm:$0xff] %vm897_vm6, %v1884_v4 }
 0x23c   : > { %911 = vst.msk [vmem:[#allocation2 + $0x68] sm:$0xff] %vm897_vm6, %v1884_v4 }
 0x23d   : > { %912 = vst.msk [vmem:[#allocation2 + $0x70] sm:$0xff] %vm897_vm6, %v1884_v4 }
 0x23e   : > { %913 = vst.msk [vmem:[#allocation2 + $0x78] sm:$0xff] %vm897_vm6, %v1884_v4 }
 0x23f PF: > { %v914_v9 = vld [vmem:[#allocation2] sm:$0xff]  ;;  %vm946_vm7 = vcmask 64512   ;;  %v915_v10 = vld [vmem:[#allocation2 + $0x8] sm:$0xff]  ;;  %v916_v6 = vld [vmem:[#allocation2 + $0x10] sm:$0xff]  ;;  %p1516_p9 = scmp.ne.s32.totalorder %s1864_s30, 1 }
 0x240   : > { %v930_v11 = vadd.f32 %v914_v9, %v2299_v2  ;;  %v931_v12 = vadd.f32 %v915_v10, %v2304_v8  ;;  %v932_v16 = vadd.f32 %v916_v6, %v2306_v17  ;;  %v917_v13 = vld [vmem:[#allocation2 + $0x18] sm:$0xff]  ;;  %v918_v14 = vld [vmem:[#allocation2 + $0x20] sm:$0xff]  ;;  %v919_v15 = vld [vmem:[#allocation2 + $0x28] sm:$0xff] }
 0x241   : > { %v933_v18 = vadd.f32 %v917_v13, %v2311_v22  ;;  %v920_v19 = vld [vmem:[#allocation2 + $0x30] sm:$0xff]  ;;  %v934_v20 = vadd.f32 %v918_v14, %v2313_v27  ;;  %v921_v21 = vld [vmem:[#allocation2 + $0x38] sm:$0xff]  ;;  %v935_v23 = vadd.f32 %v919_v15, %v2318_v29  ;;  %v922_v24 = vld [vmem:[#allocation2 + $0x40] sm:$0xff] }
 0x242   : > { %947 = vst.msk [vmem:[#allocation2] sm:$0xff] %vm946_vm7, %v930_v11  ;;  %v936_v7 = vadd.f32 %v920_v19, %v2320_v30  ;;  %v923_v44 = vld [vmem:[#allocation2 + $0x48] sm:$0xff]  ;;  %v937_v25 = vadd.f32 %v921_v21, %v2322_v31  ;;  %v924_v51 = vld [vmem:[#allocation2 + $0x50] sm:$0xff]  ;;  %v938_v59 = vadd.f32 %v922_v24, %v2324_v32  ;;  %v925_v47 = vld [vmem:[#allocation2 + $0x58] sm:$0xff] }
 0x243   : > { %948 = vst.msk [vmem:[#allocation2 + $0x8] sm:$0xff] %vm946_vm7, %v931_v12  ;;  %v939_v54 = vadd.f32 %v923_v44, %v2326_v33  ;;  %v926_v52 = vld [vmem:[#allocation2 + $0x60] sm:$0xff]  ;;  %v940_v55 = vadd.f32 %v924_v51, %v2328_v34  ;;  %v927_v26 = vld [vmem:[#allocation2 + $0x68] sm:$0xff]  ;;  %v941_v61 = vadd.f32 %v925_v47, %v2333_v36 }
 0x244   : > { %949 = vst.msk [vmem:[#allocation2 + $0x10] sm:$0xff] %vm946_vm7, %v932_v16  ;;  %v928_v63 = vld [vmem:[#allocation2 + $0x70] sm:$0xff]  ;;  %v942_v2 = vadd.f32 %v926_v52, %v2341_v46  ;;  %v943_v8 = vadd.f32 %v927_v26, %v2343_v49 }
 0x245   : > { %950 = vst.msk [vmem:[#allocation2 + $0x18] sm:$0xff] %vm946_vm7, %v933_v18  ;;  %v929_v5 = vld [vmem:[#allocation2 + $0x78] sm:$0xff]  ;;  %v944_v17 = vadd.f32 %v928_v63, %v2345_v56 }
 0x246   : > { %951 = vst.msk [vmem:[#allocation2 + $0x20] sm:$0xff] %vm946_vm7, %v934_v20  ;;  %v945_v62 = vadd.f32 %v929_v5, %v2347_v58 }
 0x247   : > { %952 = vst.msk [vmem:[#allocation2 + $0x28] sm:$0xff] %vm946_vm7, %v935_v23 }
 0x248   : > { %953 = vst.msk [vmem:[#allocation2 + $0x30] sm:$0xff] %vm946_vm7, %v936_v7 }
 0x249   : > { %954 = vst.msk [vmem:[#allocation2 + $0x38] sm:$0xff] %vm946_vm7, %v937_v25 }
 0x24a   : > { %955 = vst.msk [vmem:[#allocation2 + $0x40] sm:$0xff] %vm946_vm7, %v938_v59 }
 0x24b   : > { %956 = vst.msk [vmem:[#allocation2 + $0x48] sm:$0xff] %vm946_vm7, %v939_v54 }
 0x24c   : > { %957 = vst.msk [vmem:[#allocation2 + $0x50] sm:$0xff] %vm946_vm7, %v940_v55 }
 0x24d   : > { %958 = vst.msk [vmem:[#allocation2 + $0x58] sm:$0xff] %vm946_vm7, %v941_v61  ;;  %966 = sbr.rel (%p1516_p9) target bundleno = 817 (0x331), region = 48 }
 0x24e   : > { %959 = vst.msk [vmem:[#allocation2 + $0x60] sm:$0xff] %vm946_vm7, %v942_v2 }
 0x24f   : > { %960 = vst.msk [vmem:[#allocation2 + $0x68] sm:$0xff] %vm946_vm7, %v943_v8 }
 0x250   : > { %961 = vst.msk [vmem:[#allocation2 + $0x70] sm:$0xff] %vm946_vm7, %v944_v17 }
 0x251   : > { %962 = vst.msk [vmem:[#allocation2 + $0x78] sm:$0xff] %vm946_vm7, %v945_v62 }
 0x252   : > { %vm1202_vm10 = vcmask 64519   ;;  %v1017_v32 = vshrl.u32 %v738_v53, 7  ;;  %v975_v1 = vld [vmem:[#allocation2 + $0x40] sm:$0xff]  ;;  %v976_v3 = vld [vmem:[#allocation2 + $0x48] sm:$0xff]  ;;  %v973_v6 = vld [vmem:[#allocation2 + $0x30] sm:$0xff] }
 0x253   : > { %v977_v50 = vld [vmem:[#allocation2 + $0x50] sm:$0xff]  ;;  %v974_v11 = vld [vmem:[#allocation2 + $0x38] sm:$0xff]  ;;  %v971_v14 = vld [vmem:[#allocation2 + $0x20] sm:$0xff] }
 0x254   : > { %v1032_v37 = vadd.s32 120, %v1017_v32  ;;  %v978_v56 = vld [vmem:[#allocation2 + $0x58] sm:$0xff]  ;;  %v972_v15 = vld [vmem:[#allocation2 + $0x28] sm:$0xff]  ;;  %v969_v21 = vld [vmem:[#allocation2 + $0x10] sm:$0xff] }
 0x255   : > { %v979_v41 = vld [vmem:[#allocation2 + $0x60] sm:$0xff]  ;;  %v970_v23 = vld [vmem:[#allocation2 + $0x18] sm:$0xff]  ;;  %v968_v51 = vld [vmem:[#allocation2 + $0x8] sm:$0xff] }
 0x256   : > { %v980_v42 = vld [vmem:[#allocation2 + $0x68] sm:$0xff]  ;;  %vm1048_vm2 = vcmp.eq.s32.totalorder %v1032_v37, 127  ;;  %v967_v25 = vld [vmem:[#allocation2] sm:$0xff]  ;;  %v1573_v26 = vld [vmem:[%s2540_s4 + $0x10] sm:$0xff] }
 0x257   : > { %v981_v39 = vld [vmem:[#allocation2 + $0x70] sm:$0xff]  ;;  %v1571_v55 = vld [vmem:[%s2540_s4] sm:$0xff]  ;;  %v1572_v2 = vld [vmem:[%s2540_s4 + $0x8] sm:$0xff] }
 0x258   : > { %v982_v22 = vld [vmem:[#allocation2 + $0x78] sm:$0xff]  ;;  %v1575_v61 = vld [vmem:[%s2540_s4 + $0x20] sm:$0xff]  ;;  %v1577_v63 = vld [vmem:[%s2540_s4 + $0x30] sm:$0xff] }
 0x259   : > { %vm983_vm13 = vcmp.eq.f32.partialorder %v982_v22, 0.0  ;;  %1203 = vst.msk [vmem:[%s2351_s20 - $0x7] sm:$0x80] %vm1202_vm10, %v982_v22  ;;  %v1574_v5 = vld [vmem:[%s2540_s4 + $0x18] sm:$0xff]  ;;  %v1576_v8 = vld [vmem:[%s2540_s4 + $0x28] sm:$0xff] }
 0x25a   : > { %v984_v27 = vsel %vm983_vm13, 1.0, %v982_v22  ;;  %v1578_v17 = vld [vmem:[%s2540_s4 + $0x38] sm:$0xff] }
 0x25b   : > { %v985_v28 = vperm.slane %v984_v27, 7 }
 0x25d   : > { %1728 = vrcp.f32 %v985_v28  ;;  %v997_v31 = vand.u32 2147483648, %v985_v28  ;;  %vm991_vm14 = vweird.f32 %v985_v28  ;;  %v995_v34 = vand.u32 2147483647, %v985_v28 }
 0x25f   : > { %v998_v36 = vor.u32 1.1754944e-38, %v997_v31  ;;  %vm996_vm1 = vcmp.eq.f32.partialorder %v995_v34, 8.507059e+37 }
 0x263   : > { %v1729_v29 = vpop.eup %1728 }
 0x264   : > { %v987_v30 = vmul.f32 %v1729_v29, %v985_v28  ;;  %vm992_vm15 = vweird.f32 %v1729_v29 }
 0x265   : > { %vm993_vm0 = vmor %vm991_vm14, %vm992_vm15 }
 0x266   : > { %v988_v33 = vsub.f32 1.0, %v987_v30 }
 0x268   : > { %v989_v35 = vmul.f32 %v1729_v29, %v988_v33 }
 0x26a   : > { %v990_v38 = vadd.f32 %v1729_v29, %v989_v35 }
 0x26c   : > { %v994_v40 = vsel %vm993_vm0, %v1729_v29, %v990_v38 }
 0x26d   : > { %v999_v43 = vsel %vm996_vm1, %v998_v36, %v994_v40 }
 0x26e   : > { %v1014_v45 = vmul.f32 %v999_v43, %v981_v39  ;;  %v1015_v46 = vmul.f32 %v999_v43, %v982_v22  ;;  %v1012_v48 = vmul.f32 %v999_v43, %v979_v41  ;;  %v1013_v53 = vmul.f32 %v999_v43, %v980_v42 }
 0x26f   : > { %v1010_v60 = vmul.f32 %v999_v43, %v977_v50  ;;  %v1011_v0 = vmul.f32 %v999_v43, %v978_v56  ;;  %v1008_v9 = vmul.f32 %v999_v43, %v975_v1  ;;  %v1009_v10 = vmul.f32 %v999_v43, %v976_v3 }
 0x270   : > { %v1064_v49 = vsel %vm1048_vm2, 1.0, %v1015_v46  ;;  %v1087_v58 = vpack.c.bf16 %v1013_v53, %v1012_v48  ;;  %v1006_v16 = vmul.f32 %v999_v43, %v973_v6  ;;  %v1007_v13 = vmul.f32 %v999_v43, %v974_v11 }
 0x271   : > { %v1088_v57 = vpack.c.bf16 %v1064_v49, %v1014_v45  ;;  %v1086_v4 = vpack.c.bf16 %v1011_v0, %v1010_v60  ;;  %v1085_v12 = vpack.c.bf16 %v1009_v10, %v1008_v9  ;;  %v1004_v19 = vmul.f32 %v999_v43, %v971_v14 }
 0x272   : > { %v1084_v18 = vpack.c.bf16 %v1007_v13, %v1006_v16  ;;  %v1005_v20 = vmul.f32 %v999_v43, %v972_v15  ;;  %v1002_v7 = vmul.f32 %v999_v43, %v969_v21  ;;  %v1003_v44 = vmul.f32 %v999_v43, %v970_v23 }
 0x273   : > { %1137 = vmatpush.bf16.msra.mxu0 %v1088_v57  ;;  %1595 = vmatpush.bf16.msra.mxu1 %v1088_v57  ;;  %v1000_v47 = vmul.f32 %v999_v43, %v967_v25  ;;  %v1001_v54 = vmul.f32 %v999_v43, %v968_v51 }
 0x274   : > { %1596 = vmatpush.bf16.msra.mxu2 %v1088_v57  ;;  %1597 = vmatpush.bf16.msra.mxu3 %v1088_v57  ;;  %v1083_v24 = vpack.c.bf16 %v1005_v20, %v1004_v19  ;;  %v1082_v59 = vpack.c.bf16 %v1003_v44, %v1002_v7 }
 0x275   : > { %v1081_v52 = vpack.c.bf16 %v1001_v54, %v1000_v47 }
 0x277   : > { %1138 = vmatpush.bf16.msra.mxu0 %v1087_v58  ;;  %1598 = vmatpush.bf16.msra.mxu1 %v1087_v58 }
 0x278   : > { %1599 = vmatpush.bf16.msra.mxu2 %v1087_v58  ;;  %1600 = vmatpush.bf16.msra.mxu3 %v1087_v58 }
 0x27b   : > { %1139 = vmatpush.bf16.msra.mxu0 %v1086_v4  ;;  %1601 = vmatpush.bf16.msra.mxu1 %v1086_v4 }
 0x27c   : > { %1602 = vmatpush.bf16.msra.mxu2 %v1086_v4  ;;  %1603 = vmatpush.bf16.msra.mxu3 %v1086_v4 }
 0x27f   : > { %1140 = vmatpush.bf16.msra.mxu0 %v1085_v12  ;;  %1604 = vmatpush.bf16.msra.mxu1 %v1085_v12 }
 0x280   : > { %1605 = vmatpush.bf16.msra.mxu2 %v1085_v12  ;;  %1606 = vmatpush.bf16.msra.mxu3 %v1085_v12 }
 0x283   : > { %1141 = vmatpush.bf16.msra.mxu0 %v1084_v18  ;;  %1607 = vmatpush.bf16.msra.mxu1 %v1084_v18 }
 0x284   : > { %1608 = vmatpush.bf16.msra.mxu2 %v1084_v18  ;;  %1609 = vmatpush.bf16.msra.mxu3 %v1084_v18 }
 0x287   : > { %1142 = vmatpush.bf16.msra.mxu0 %v1083_v24  ;;  %1610 = vmatpush.bf16.msra.mxu1 %v1083_v24 }
 0x288   : > { %1611 = vmatpush.bf16.msra.mxu2 %v1083_v24  ;;  %1612 = vmatpush.bf16.msra.mxu3 %v1083_v24 }
 0x28b   : > { %1143 = vmatpush.bf16.msra.mxu0 %v1082_v59  ;;  %1613 = vmatpush.bf16.msra.mxu1 %v1082_v59 }
 0x28c   : > { %1614 = vmatpush.bf16.msra.mxu2 %v1082_v59  ;;  %1615 = vmatpush.bf16.msra.mxu3 %v1082_v59 }
 0x28f   : > { %1144 = vmatpush.bf16.msra.mxu0 %v1081_v52  ;;  %1616 = vmatpush.bf16.msra.mxu1 %v1081_v52 }
 0x290   : > { %1617 = vmatpush.bf16.msra.mxu2 %v1081_v52  ;;  %1618 = vmatpush.bf16.msra.mxu3 %v1081_v52 }
 0x292   : > { %1145 = vmatmul.bf16.vlgmr.msra.gmra.mxu0 %v1571_v55  ;;  %1155 = vmatmul.bf16.vlgmr.msra.gmra.mxu1 %v1573_v26 }
 0x293   : > { %1165 = vmatmul.bf16.vlgmr.msra.gmra.mxu2 %v1575_v61  ;;  %1175 = vmatmul.bf16.vlgmr.msra.gmra.mxu3 %v1577_v63 }
 0x2a2   : > { %1150 = vmatmul.bf16.gmra.mxu0 %v1572_v2  ;;  %1160 = vmatmul.bf16.gmra.mxu1 %v1574_v5 }
 0x2a3   : > { %1170 = vmatmul.bf16.gmra.mxu2 %v1576_v8  ;;  %1180 = vmatmul.bf16.gmra.mxu3 %v1578_v17 }
 0x30f   : > { %v1146_v62 = vpop.f32.mrf.mxu0  ;;  %v1156_v22 = vpop.f32.mrf.mxu1 }
 0x310   : > { %1186 = vst.msk [vmem:[%s2056_s10] sm:$0xff] %vm946_vm7, %v1146_v62 }
 0x311   : > { %1190 = vst.msk [vmem:[%s2056_s10 + $0x20] sm:$0xff] %vm946_vm7, %v1156_v22 }
 0x316   : > { %v1166_v27 = vpop.f32.mrf.mxu2  ;;  %v1176_v28 = vpop.f32.mrf.mxu3 }
 0x317   : > { %1194 = vst.msk [vmem:[%s2056_s10 + $0x40] sm:$0xff] %vm946_vm7, %v1166_v27  ;;  %v1148_v29 = vpop.f32.mrf.mxu0  ;;  %v1158_v30 = vpop.f32.mrf.mxu1 }
 0x318   : > { %1198 = vst.msk [vmem:[%s2056_s10 + $0x60] sm:$0xff] %vm946_vm7, %v1176_v28 }
 0x319   : > { %1187 = vst.msk [vmem:[%s2056_s10 + $0x8] sm:$0xff] %vm946_vm7, %v1148_v29 }
 0x31a   : > { %1191 = vst.msk [vmem:[%s2056_s10 + $0x28] sm:$0xff] %vm946_vm7, %v1158_v30 }
 0x31e   : > { %v1168_v31 = vpop.f32.mrf.mxu2  ;;  %v1178_v32 = vpop.f32.mrf.mxu3 }
 0x31f   : > { %1195 = vst.msk [vmem:[%s2056_s10 + $0x48] sm:$0xff] %vm946_vm7, %v1168_v31  ;;  %v1151_v33 = vpop.f32.mrf.mxu0  ;;  %v1161_v34 = vpop.f32.mrf.mxu1 }
 0x320   : > { %1199 = vst.msk [vmem:[%s2056_s10 + $0x68] sm:$0xff] %vm946_vm7, %v1178_v32 }
 0x321   : > { %1188 = vst.msk [vmem:[%s2056_s10 + $0x10] sm:$0xff] %vm946_vm7, %v1151_v33 }
 0x322   : > { %1192 = vst.msk [vmem:[%s2056_s10 + $0x30] sm:$0xff] %vm946_vm7, %v1161_v34 }
 0x326   : > { %v1171_v35 = vpop.f32.mrf.mxu2  ;;  %v1181_v36 = vpop.f32.mrf.mxu3 }
 0x327   : > { %1196 = vst.msk [vmem:[%s2056_s10 + $0x50] sm:$0xff] %vm946_vm7, %v1171_v35  ;;  %v1153_v37 = vpop.f32.mrf.mxu0  ;;  %v1163_v38 = vpop.f32.mrf.mxu1 }
 0x328   : > { %1200 = vst.msk [vmem:[%s2056_s10 + $0x70] sm:$0xff] %vm946_vm7, %v1181_v36 }
 0x329   : > { %1189 = vst.msk [vmem:[%s2056_s10 + $0x18] sm:$0xff] %vm946_vm7, %v1153_v37 }
 0x32a   : > { %1193 = vst.msk [vmem:[%s2056_s10 + $0x38] sm:$0xff] %vm946_vm7, %v1163_v38 }
 0x32e   : > { %v1173_v39 = vpop.f32.mrf.mxu2  ;;  %v1183_v40 = vpop.f32.mrf.mxu3 }
 0x32f   : > { %1197 = vst.msk [vmem:[%s2056_s10 + $0x58] sm:$0xff] %vm946_vm7, %v1173_v39 }
 0x330   : > { %1201 = vst.msk [vmem:[%s2056_s10 + $0x78] sm:$0xff] %vm946_vm7, %v1183_v40 }
 0x331 PF: > { %s1550_s29 = sshll.u32 %s1868_s8, 3  ;;  %s1227_s12 = sshll.u32 %s2335_s27, 4  ;;  %s1228_s12 = int_to_ptr.vmem [resolvable:$true] %s1227_s12 }
 0x332   : > { %s1224_s9 = sadd.s32 %s1864_s30, %s1550_s29  ;;  %s1205_s17 = scalar_lea.sflag [#allocation4], %s321_s14 }
 0x333   : > { %s1551_s16 = sshll.u32 %s1224_s9, 3  ;;  %s1750_s27 = scalar_lea.hbm %s2541_s5, 128 }
 0x334   : > { %s1226_s15 = scalar_lea.hbm %s2541_s5, %s1551_s16 }
 0x335   : > { %s1229_s26 = sshll.u32 %s1226_s15, 4  ;;  %s1230_s26 = int_to_ptr.hbm [resolvable:$true] %s1229_s26 }
 0x336   : > { %s1744_s10 = sshra.s32 %s1230_s26, 4  ;;  %s1745_s10 = int_to_ptr.hbm [resolvable:$true] %s1744_s10 }
 0x337   : > { %s1746_s21 = scalar_lea.hbm %s1745_s10, 32  ;;  %p1751_p1 = scmp.lt.s32.totalorder %s1745_s10, %s2541_s5 }
 0x338   : > { %p1747_p10 = scmp.ne.s32.totalorder %s1745_s10, %s1746_s21  ;;  %p1752_p4 = scmp.lt.s32.totalorder %s1750_s27, %s1746_s21 }
 0x33a   : > { %p1748_p11 = pnand %p1747_p10, %p2001_p3  ;;  %p1753_p2 = por %p1752_p4, %p1751_p1 }
 0x33c   : > { %p1749_p0 = pneg %p1748_p11 }
 0x33e   : > { %p1754_p5 = pnand %p1753_p2, %p1749_p0 }
 0x340   : > { %1757 = shalt.err (!%p1754_p5)
}
 0x341   : > { %s1885_s14 = smov 128   ;;  %s1886_s16 = smov 256  }
 0x342   : > { %s1887_s18 = smov 8   ;;  %s1244_s15 = scalar_lea.hbm %s2543_s7, %s1868_s8 }
 0x343   : > { %1619 = dma.vmem_to_hbm [thread:$0]  (%p2001_p3), %s1228_s12, 512, %s1230_s26, %s1205_s17, %s1885_s14, %s1886_s16, %s1887_s18  }
 0x344   : > { %s1246_s30 = sshll.u32 %s2351_s20, 4  ;;  %s1248_s10 = sshll.u32 %s1244_s15, 4  ;;  %s1247_s30 = int_to_ptr.vmem [resolvable:$true] %s1246_s30  ;;  %s1249_s10 = int_to_ptr.hbm [resolvable:$true] %s1248_s10 }
 0x345   : > { %s2589_s21 = sand.u32 1, %s1844_s25   ;;  %s1772_s29 = sshra.s32 %s1249_s10, 4  ;;  %s1773_s29 = int_to_ptr.hbm [resolvable:$true] %s1772_s29 }
 0x346   : > { %s1215_s27 = scalar_lea.sflag [#allocation6], %s2589_s21  ;;  %s1774_s9 = scalar_lea.hbm %s1773_s29, 1 }
 0x347   : > { %p1775_p6 = scmp.ne.s32.totalorder %s1773_s29, %s1774_s9  ;;  %s1778_s12 = scalar_lea.hbm %s2543_s7, 2 }
 0x348   : > { %p1779_p3 = scmp.lt.s32.totalorder %s1773_s29, %s2543_s7  ;;  %p1780_p10 = scmp.lt.s32.totalorder %s1778_s12, %s1774_s9 }
 0x349   : > { %p1776_p8 = pnand %p1775_p6, %p2028_p12 }
 0x34a   : > { %p1781_p11 = por %p1780_p10, %p1779_p3 }
 0x34b   : > { %p1777_p9 = pneg %p1776_p8 }
 0x34d   : > { %p1782_p0 = pnand %p1781_p11, %p1777_p9 }
 0x34f   : > { %1785 = shalt.err (!%p1782_p0)
}
 0x350   : > { %1620 = dma.vmem_to_hbm [thread:$0]  (%p2028_p12), %s1247_s30, 16, %s1249_s10, %s1215_s27  }
 0x351 PF: > { %s2590_s8 = sld [smem:[#allocation10_spill]]  ;;  %p1630_p1 = scmp.ge.s32.totalorder %s1880_s11, 2 }
 0x353   : > { %p1624_p4 = pnand %p1630_p1, %p2016_p7 }
 0x355   : > { %p1625_p2 = pneg %p1624_p4 }
 0x357   : > { %s1260_s20 = sand.u32 1, %s2590_s8  }
 0x358   : > { %s1261_s1 = scalar_lea.sflag [#allocation4], %s1260_s20 }
 0x359   : > { %1831 = dma.done.wait (%p1625_p2), %s1261_s1, 512  }
 0x35a   : > { %1833 = vsyncadd (%p1625_p2), %s1261_s1, 4294966784  ;;  %s1278_s16 = sand.u32 1, %s1840_s24   ;;  %p1627_p5 = pnand %p1630_p1, %p2040_p13 }
 0x35b   : > { %s1279_s13 = scalar_lea.sflag [#allocation6], %s1278_s16 }
 0x35c   : > { %p1628_p6 = pneg %p1627_p5 }
 0x35e   : > { %1835 = dma.done.wait (%p1628_p6), %s1279_s13, 16  }
 0x35f   : > { %1837 = vsyncadd (%p1628_p6), %s1279_s13, 4294967280  ;;  %s24_s11 = sadd.s32 1, %s1880_s11   ;;  %s2592_s18 = sld [smem:[#allocation9_spill]] }
 0x360   : > { %p21_p12 = scmp.ge.s32.totalorder %s24_s11, 6   ;;  %s2593_s26 = sld [smem:[#allocation16_spill]] }
 0x361   : > { %s2594_s22 = sld [smem:[#allocation11_spill]]  ;;  %s2600_s24 = smov %s1844_s25 }
 0x362   : > { %s2595_s29 = sld [smem:[#allocation17_spill]]  ;;  %s2602_s27 = smov %s1856_s28 }
 0x363   : > { %s2596_s30 = sld [smem:[#allocation12_spill]]  ;;  %23 = sbr.rel (!%p21_p12) target bundleno = 12 (0xc), region = 115 }
 0x364   : > { %s2597_s8 = sld [smem:[#allocation13_spill]] }
 0x365   : > { %s2598_s9 = sld [smem:[#allocation14_spill]]  ;;  %s2601_s25 = smov %s2592_s18 }
 0x366   : > { %s2599_s10 = sld [smem:[#allocation15_spill]] }
 0x367   : > { %s2603_s28 = smov %s2594_s22 }
 0x368   :  { %1284 = vsyncpa [#allocation4], 1 }
 0x369   :  { %1286 = vsyncpa [#allocation4 + $0x1], 1 }
 0x36a   :  { %1287 = vsyncpa [#allocation6], 1 }
 0x36b   :  { %1289 = vsyncpa [#allocation6 + $0x1], 1 }

</bundles_post_ra>
